<compile_context>
chip_gen: v6e
topology: v6e:2x2x1
jax: 0.10.0
libtpu: 0.0.40
codegen_flags: <defaults>
</compile_context>

<pallas_src>
import functools

import jax
import jax.numpy as jnp
from jax.experimental import pallas as pl
from jax.experimental.pallas import tpu as pltpu


def _multicritic_kernel(s_ref, a_ref,
                        w1s_ref, w1a_ref, b1_ref,
                        w2_ref, b2_ref,
                        w3_ref, b3_ref,
                        w4_ref, b4_ref,
                        out_ref):
    """Single grid step: all nets, all layers, entirely in VMEM."""
    s = s_ref[...]                                    # (B, n_states)
    a = a_ref[...]                                    # (B, n_actions)

    # Layer 1: concat folded into two matmuls over the packed (D_in, n_nets*H) weight.
    h = (jnp.dot(s, w1s_ref[...], preferred_element_type=jnp.float32)
         + jnp.dot(a, w1a_ref[...], preferred_element_type=jnp.float32)
         + b1_ref[...])
    h = jnp.maximum(h, 0.0)                           # (B, n_nets*H)

    # Layers 2/3: block-diagonal packed weights -> one matmul per layer for all nets.
    h = jnp.dot(h, w2_ref[...], preferred_element_type=jnp.float32) + b2_ref[...]
    h = jnp.maximum(h, 0.0)

    h = jnp.dot(h, w3_ref[...], preferred_element_type=jnp.float32) + b3_ref[...]
    h = jnp.maximum(h, 0.0)

    # Layer 4: block-diagonal (n_nets*H, n_nets*Q) -> lane-dense (B, n_nets*Q) output.
    q = jnp.dot(h, w4_ref[...], preferred_element_type=jnp.float32) + b4_ref[...]

    out_ref[...] = q.astype(out_ref.dtype)


@functools.partial(jax.jit, static_argnames=("n_nets", "n_quantiles"))
def multicritic_forward(state, action, packed, *, n_nets, n_quantiles):
    """packed: dict of lane-fused weights produced by pack_params()."""
    B = state.shape[0]
    out_cols = n_nets * n_quantiles

    vmem = pl.BlockSpec(memory_space=pltpu.MemorySpace.VMEM)

    out = pl.pallas_call(
        _multicritic_kernel,
        out_shape=jax.ShapeDtypeStruct((B, out_cols), state.dtype),
        in_specs=[vmem] * 11,
        out_specs=vmem,
    )(state, action,
      packed["w1s"], packed["w1a"], packed["b1"],
      packed["w2"], packed["b2"],
      packed["w3"], packed["b3"],
      packed["w4"], packed["b4"])

    # Row-major metadata reshape (bitcast) back to the PyTorch (B, n_nets, Q) convention.
    return out.reshape(B, n_nets, n_quantiles)


def _block_diag(mats):
    """Dense block-diagonal matrix from a list of 2-D blocks."""
    n = len(mats)
    rows = []
    for i, m in enumerate(mats):
        row = [m if j == i else jnp.zeros((m.shape[0], mats[j].shape[1]), m.dtype)
               for j in range(n)]
        rows.append(jnp.concatenate(row, axis=1))
    return jnp.concatenate(rows, axis=0)


def pack_params(params, n_states):
    """One-time (outside the jitted forward) repack of per-net weights into the
    lane-fused layout consumed by the kernel."""
    n_nets = params["w1"].shape[0]
    w1_cat = jnp.concatenate([params["w1"][i] for i in range(n_nets)], axis=1)  # (D_in, n*H)
    return {
        "w1s": w1_cat[:n_states],                                               # (n_states, n*H)
        "w1a": w1_cat[n_states:],                                               # (n_actions, n*H)
        "b1": jnp.concatenate([params["b1"][i] for i in range(n_nets)], axis=1),  # (1, n*H)
        "w2": _block_diag([params["w2"][i] for i in range(n_nets)]),            # (n*H, n*H)
        "b2": jnp.concatenate([params["b2"][i] for i in range(n_nets)], axis=1),
        "w3": _block_diag([params["w3"][i] for i in range(n_nets)]),            # (n*H, n*H)
        "b3": jnp.concatenate([params["b3"][i] for i in range(n_nets)], axis=1),
        "w4": _block_diag([params["w4"][i] for i in range(n_nets)]),            # (n*H, n*Q)
        "b4": jnp.concatenate([params["b4"][i] for i in range(n_nets)], axis=1),  # (1, n*Q)
    }


def init_params(key, n_states, n_actions, hidden, n_quantiles, n_nets):
    """Deterministic PyTorch-Linear-style init: U(-1/sqrt(fan_in), 1/sqrt(fan_in))."""
    d_in = n_states + n_actions
    dims = [(d_in, hidden), (hidden, hidden), (hidden, hidden), (hidden, n_quantiles)]
    params = {}
    for li, (fi, fo) in enumerate(dims, start=1):
        key, kw, kb = jax.random.split(key, 3)
        bound = 1.0 / jnp.sqrt(jnp.float32(fi))
        params[f"w{li}"] = jax.random.uniform(
            kw, (n_nets, fi, fo), jnp.float32, -bound, bound)
        params[f"b{li}"] = jax.random.uniform(
            kb, (n_nets, 1, fo), jnp.float32, -bound, bound)
    return params


def _reference_forward(state, action, params):
    """Pure-JAX reference mirroring the PyTorch module (per-net, unpacked weights)."""
    x = jnp.concatenate([state, action], axis=1)
    outs = []
    n_nets = params["w1"].shape[0]
    for i in range(n_nets):
        h = jnp.maximum(x @ params["w1"][i] + params["b1"][i], 0.0)
        h = jnp.maximum(h @ params["w2"][i] + params["b2"][i], 0.0)
        h = jnp.maximum(h @ params["w3"][i] + params["b3"][i], 0.0)
        outs.append(h @ params["w4"][i] + params["b4"][i])
    return jnp.stack(outs, axis=1)                   # (B, n_nets, Q)


if __name__ == "__main__":
    # Small, MultiCritic-consistent shapes.
    B = 8
    N_STATES = 12
    N_ACTIONS = 4
    HIDDEN = 32          # args.cri_hidden_size
    N_QUANTILES = 8      # args.n_quantiles
    N_NETS = 3           # args.n_nets

    key = jax.random.PRNGKey(0)
    k_s, k_a, k_p = jax.random.split(key, 3)
    state = jax.random.normal(k_s, (B, N_STATES), jnp.float32)
    action = jax.random.normal(k_a, (B, N_ACTIONS), jnp.float32)
    params = init_params(k_p, N_STATES, N_ACTIONS, HIDDEN, N_QUANTILES, N_NETS)
    packed = pack_params(params, N_STATES)           # one-time layout transform

    quantiles = multicritic_forward(state, action, packed,
                                    n_nets=N_NETS, n_quantiles=N_QUANTILES)
    quantiles = jax.block_until_ready(quantiles)

    ref = _reference_forward(state, action, params)
    assert quantiles.shape == (B, N_NETS, N_QUANTILES), quantiles.shape
    assert jnp.allclose(quantiles, ref, atol=1e-4, rtol=1e-4), "mismatch vs JAX reference"

    print("KERNEL_OK")
</pallas_src>

<mosaic_0001>
module attributes {stable_mosaic.version = 11 : i64} {
  func.func @_multicritic_kernel(%arg0: memref<8x12xf32, #tpu.memory_space<vmem>>, %arg1: memref<8x4xf32, #tpu.memory_space<vmem>>, %arg2: memref<12x96xf32, #tpu.memory_space<vmem>>, %arg3: memref<4x96xf32, #tpu.memory_space<vmem>>, %arg4: memref<1x96xf32, #tpu.memory_space<vmem>>, %arg5: memref<96x96xf32, #tpu.memory_space<vmem>>, %arg6: memref<1x96xf32, #tpu.memory_space<vmem>>, %arg7: memref<96x96xf32, #tpu.memory_space<vmem>>, %arg8: memref<1x96xf32, #tpu.memory_space<vmem>>, %arg9: memref<96x24xf32, #tpu.memory_space<vmem>>, %arg10: memref<1x24xf32, #tpu.memory_space<vmem>>, %arg11: memref<8x24xf32, #tpu.memory_space<vmem>>) attributes {dimension_semantics = [], scalar_prefetch = 0 : i64, scratch_operands = 0 : i64, tpu.core_type = #tpu.core_type<tc>} {
    %c0 = arith.constant 0 : index
    %c0_0 = arith.constant 0 : index
    %0 = vector.load %arg0[%c0, %c0_0] : memref<8x12xf32, #tpu.memory_space<vmem>>, vector<8x12xf32>
    %c0_1 = arith.constant 0 : index
    %c0_2 = arith.constant 0 : index
    %1 = vector.load %arg1[%c0_1, %c0_2] : memref<8x4xf32, #tpu.memory_space<vmem>>, vector<8x4xf32>
    %c0_3 = arith.constant 0 : index
    %c0_4 = arith.constant 0 : index
    %2 = vector.load %arg2[%c0_3, %c0_4] : memref<12x96xf32, #tpu.memory_space<vmem>>, vector<12x96xf32>
    %cst = arith.constant dense<0.000000e+00> : vector<8x96xf32>
    %3 = tpu.matmul %0, %2, %cst {dimension_numbers = #tpu.dot_dimension_numbers<[1], [0], [0], [1], [0, 0, 1, 1], [], []>} : vector<8x12xf32>, vector<12x96xf32>, vector<8x96xf32> -> vector<8x96xf32>
    %c0_5 = arith.constant 0 : index
    %c0_6 = arith.constant 0 : index
    %4 = vector.load %arg3[%c0_5, %c0_6] : memref<4x96xf32, #tpu.memory_space<vmem>>, vector<4x96xf32>
    %cst_7 = arith.constant dense<0.000000e+00> : vector<8x96xf32>
    %5 = tpu.matmul %1, %4, %cst_7 {dimension_numbers = #tpu.dot_dimension_numbers<[1], [0], [0], [1], [0, 0, 1, 1], [], []>} : vector<8x4xf32>, vector<4x96xf32>, vector<8x96xf32> -> vector<8x96xf32>
    %6 = arith.addf %3, %5 : vector<8x96xf32>
    %c0_8 = arith.constant 0 : index
    %c0_9 = arith.constant 0 : index
    %7 = vector.load %arg4[%c0_8, %c0_9] : memref<1x96xf32, #tpu.memory_space<vmem>>, vector<1x96xf32>
    %8 = vector.broadcast %7 : vector<1x96xf32> to vector<8x96xf32>
    %9 = arith.addf %6, %8 : vector<8x96xf32>
    %cst_10 = arith.constant 0.000000e+00 : f32
    %10 = vector.broadcast %cst_10 : f32 to vector<8x96xf32>
    %11 = arith.maximumf %9, %10 : vector<8x96xf32>
    %c0_11 = arith.constant 0 : index
    %c0_12 = arith.constant 0 : index
    %12 = vector.load %arg5[%c0_11, %c0_12] : memref<96x96xf32, #tpu.memory_space<vmem>>, vector<96x96xf32>
    %cst_13 = arith.constant dense<0.000000e+00> : vector<8x96xf32>
    %13 = tpu.matmul %11, %12, %cst_13 {dimension_numbers = #tpu.dot_dimension_numbers<[1], [0], [0], [1], [0, 0, 1, 1], [], []>} : vector<8x96xf32>, vector<96x96xf32>, vector<8x96xf32> -> vector<8x96xf32>
    %c0_14 = arith.constant 0 : index
    %c0_15 = arith.constant 0 : index
    %14 = vector.load %arg6[%c0_14, %c0_15] : memref<1x96xf32, #tpu.memory_space<vmem>>, vector<1x96xf32>
    %15 = vector.broadcast %14 : vector<1x96xf32> to vector<8x96xf32>
    %16 = arith.addf %13, %15 : vector<8x96xf32>
    %cst_16 = arith.constant 0.000000e+00 : f32
    %17 = vector.broadcast %cst_16 : f32 to vector<8x96xf32>
    %18 = arith.maximumf %16, %17 : vector<8x96xf32>
    %c0_17 = arith.constant 0 : index
    %c0_18 = arith.constant 0 : index
    %19 = vector.load %arg7[%c0_17, %c0_18] : memref<96x96xf32, #tpu.memory_space<vmem>>, vector<96x96xf32>
    %cst_19 = arith.constant dense<0.000000e+00> : vector<8x96xf32>
    %20 = tpu.matmul %18, %19, %cst_19 {dimension_numbers = #tpu.dot_dimension_numbers<[1], [0], [0], [1], [0, 0, 1, 1], [], []>} : vector<8x96xf32>, vector<96x96xf32>, vector<8x96xf32> -> vector<8x96xf32>
    %c0_20 = arith.constant 0 : index
    %c0_21 = arith.constant 0 : index
    %21 = vector.load %arg8[%c0_20, %c0_21] : memref<1x96xf32, #tpu.memory_space<vmem>>, vector<1x96xf32>
    %22 = vector.broadcast %21 : vector<1x96xf32> to vector<8x96xf32>
    %23 = arith.addf %20, %22 : vector<8x96xf32>
    %cst_22 = arith.constant 0.000000e+00 : f32
    %24 = vector.broadcast %cst_22 : f32 to vector<8x96xf32>
    %25 = arith.maximumf %23, %24 : vector<8x96xf32>
    %c0_23 = arith.constant 0 : index
    %c0_24 = arith.constant 0 : index
    %26 = vector.load %arg9[%c0_23, %c0_24] : memref<96x24xf32, #tpu.memory_space<vmem>>, vector<96x24xf32>
    %cst_25 = arith.constant dense<0.000000e+00> : vector<8x24xf32>
    %27 = tpu.matmul %25, %26, %cst_25 {dimension_numbers = #tpu.dot_dimension_numbers<[1], [0], [0], [1], [0, 0, 1, 1], [], []>} : vector<8x96xf32>, vector<96x24xf32>, vector<8x24xf32> -> vector<8x24xf32>
    %c0_26 = arith.constant 0 : index
    %c0_27 = arith.constant 0 : index
    %28 = vector.load %arg10[%c0_26, %c0_27] : memref<1x24xf32, #tpu.memory_space<vmem>>, vector<1x24xf32>
    %29 = vector.broadcast %28 : vector<1x24xf32> to vector<8x24xf32>
    %30 = arith.addf %27, %29 : vector<8x24xf32>
    %c0_28 = arith.constant 0 : index
    %c0_29 = arith.constant 0 : index
    %31 = vector.load %arg11[%c0_28, %c0_29] : memref<8x24xf32, #tpu.memory_space<vmem>>, vector<8x24xf32>
    tpu.vector_store %arg11[%c0_28, %c0_29], %30 {strides = array<i32>} : memref<8x24xf32, #tpu.memory_space<vmem>>, vector<8x24xf32>,
    return
  }
}

</mosaic_0001>

<bundles_post_ra>
// kernel: multicritic_forward.1
= control target key start
LH: loop header
LB: loop body
LE: loop exit
PB: predicated region body
PF: predicated region fallthrough
CT: control target
= control target key end

     0   :  { %16 = vsyncpa [#allocation3], 0  ;;  %s974_s0 = inlined_call_operand.vmem [shape: f32[8,12], index: 0, kind: input, shape index: {}]   ;;  %s975_s1 = inlined_call_operand.vmem [shape: f32[8,4], index: 1, kind: input, shape index: {}]   ;;  %s976_s2 = inlined_call_operand.vmem [shape: f32[12,96], index: 2, kind: input, shape index: {}]   ;;  %s977_s3 = inlined_call_operand.vmem [shape: f32[4,96], index: 3, kind: input, shape index: {}]   ;;  %s978_s4 = inlined_call_operand.vmem [shape: f32[1,96], index: 4, kind: input, shape index: {}]   ;;  %s979_s5 = inlined_call_operand.vmem [shape: f32[96,96], index: 5, kind: input, shape index: {}]   ;;  %s980_s6 = inlined_call_operand.vmem [shape: f32[1,96], index: 6, kind: input, shape index: {}]   ;;  %s981_s7 = inlined_call_operand.hbm [shape: f32[96,96], index: 7, kind: input, shape index: {}]   ;;  %s982_s8 = inlined_call_operand.hbm [shape: f32[1,96], index: 8, kind: input, shape index: {}]   ;;  %s983_s9 = inlined_call_operand.vmem [shape: f32[96,24], index: 9, kind: input, shape index: {}]   ;;  %s984_s10 = inlined_call_operand.hbm [shape: f32[1,24], index: 10, kind: input, shape index: {}]   ;;  %s985_s11 = inlined_call_operand.vmem [shape: f32[8,24], index: 11, kind: output, shape index: {}]  }
   0x1   :  { %17 = vsyncpa [#allocation5], 0  ;;  %s750_s17 = smov [#allocation4]   ;;  %s751_s19 = smov [#allocation2]  }
   0x2   :  { %s50_s18 = sshll.u32 %s750_s17, 4  ;;  %s37_s20 = sshll.u32 %s751_s19, 4  ;;  %s51_s18 = int_to_ptr.vmem [resolvable:$true] %s50_s18  ;;  %s38_s20 = int_to_ptr.vmem [resolvable:$true] %s37_s20 }
   0x3   :  { %s694_s21 = scalar_lea.vmem %s51_s18, 16  ;;  %s698_s22 = scalar_lea.vmem %s51_s18, 32 }
   0x4   :  { %p695_p0 = scmp.ne.s32.totalorder %s51_s18, %s694_s21  ;;  %p699_p1 = scmp.lt.s32.totalorder %s51_s18, %s51_s18 }
   0x5   :  { %p700_p2 = scmp.lt.s32.totalorder %s698_s22, %s694_s21 }
   0x7   :  { %p701_p3 = por %p700_p2, %p699_p1 }
   0x9   :  { %p702_p4 = pnand %p701_p3, %p695_p0 }
   0xb   :  { %705 = shalt.err (!%p702_p4)
}
   0xc   :  { %53 = dma.hbm_to_vmem [thread:$0]  %s982_s8, 16, %s51_s18, [#allocation5]  }
   0xd   :  { %s714_s25 = scalar_lea.vmem %s38_s20, 1536  ;;  %p719_p6 = scmp.lt.s32.totalorder %s38_s20, %s38_s20 }
   0xe   :  { %p715_p5 = scmp.ne.s32.totalorder %s38_s20, %s714_s25  ;;  %p720_p7 = scmp.lt.s32.totalorder %s714_s25, %s714_s25 }
  0x10   :  { %p721_p8 = por %p720_p7, %p719_p6 }
  0x12   :  { %p722_p9 = pnand %p721_p8, %p715_p5 }
  0x14   :  { %725 = shalt.err (!%p722_p9)
}
  0x15   :  { %s752_s26 = smov 128   ;;  %s753_s27 = smov 8  }
  0x16   :  { %43 = dma.hbm_to_vmem [thread:$0]  %s981_s7, 1536, %s38_s20, [#allocation3], %s752_s26, %s752_s26, %s753_s27  }
  0x17   :  { %s754_s30 = smov [#allocation6]  }
  0x18   :  { %s62_s12 = sshll.u32 %s754_s30, 4  ;;  %s63_s12 = int_to_ptr.vmem [resolvable:$true] %s62_s12 }
  0x19   :  { %s734_s13 = scalar_lea.vmem %s63_s12, 16  ;;  %s738_s14 = scalar_lea.vmem %s63_s12, 32 }
  0x1a   :  { %p735_p10 = scmp.ne.s32.totalorder %s63_s12, %s734_s13  ;;  %p739_p11 = scmp.lt.s32.totalorder %s63_s12, %s63_s12 }
  0x1b   :  { %p740_p12 = scmp.lt.s32.totalorder %s738_s14, %s734_s13 }
  0x1d   :  { %p741_p13 = por %p740_p12, %p739_p11 }
  0x1f   :  { %p742_p0 = pnand %p741_p13, %p735_p10 }
  0x21   :  { %745 = shalt.err (!%p742_p0)
}
  0x22   :  { %65 = dma.hbm_to_vmem [thread:$0]  %s984_s10, 16, %s63_s12, [#allocation5]  }
  0x23   :  { %746 = dma.done.wait [#allocation3], 1536  }
  0x24   :  { %747 = vsyncadd [#allocation3], 4294965760 }
  0x25   :  { %748 = dma.done.wait [#allocation5], 32  }
  0x26   :  { %749 = vsyncadd [#allocation5], 4294967264  ;;  %v755_v0 = vmov 0.0   ;;  %vm756_vm0 = vmmov 0   ;;  %vm84_vm1 = vcmask 1043456   ;;  %vm80_vm2 = vcmask 31744  }
  0x27   :  { %586 = vmatprep.subr.mxu1 %v755_v0  ;;  %588 = vmatprep.mubr.msk.f32.mxu1 %vm756_vm0, %v755_v0  ;;  %v79_v1 = vld [vmem:[%s977_s3] sm:$0xf]  ;;  %v78_v3 = vld [vmem:[%s976_s2 + $0x8] sm:$0xf]  ;;  %v255_v4 = vld [vmem:[%s979_s5 + $0x58] sm:$0xff]  ;;  %vm158_vm3 = vcmask 97280  }
  0x28   :  { %598 = vmatprep.subr.mxu0 %v755_v0  ;;  %622 = vmatprep.mubr.msk.f32.mxu0 %vm756_vm0, %v755_v0  ;;  %v76_v2 = vld [vmem:[%s975_s1] sm:$0xff]  ;;  %v254_v7 = vld [vmem:[%s979_s5 + $0x50] sm:$0xff]  ;;  %v253_v8 = vld [vmem:[%s979_s5 + $0x48] sm:$0xff]  ;;  %vm263_vm4 = vcmask 785408   ;;  %vm523_vm5 = vcmask 195584  }
  0x29   :  { %587 = vmatpush3.msk.msra.mxu1 %vm84_vm1, %v79_v1  ;;  %v77_v5 = vld [vmem:[%s976_s2] sm:$0xff]  ;;  %599 = vmatpush3.msra.mxu0 %v255_v4  ;;  %v251_v10 = vld [vmem:[%s979_s5 + $0x38] sm:$0xff]  ;;  %v250_v11 = vld [vmem:[%s979_s5 + $0x30] sm:$0xff] }
  0x2a   :  { %589 = vmatmul.mubr.msk.f32.vlgmr.msra.gmra.mxu1 %vm80_vm2, %v76_v2  ;;  %591 = vmatprep.subr.mxu1 %v755_v0  ;;  %v75_v6 = vld [vmem:[%s974_s0] sm:$0xff]  ;;  %v249_v12 = vld [vmem:[%s979_s5 + $0x28] sm:$0xff]  ;;  %v247_v14 = vld [vmem:[%s979_s5 + $0x18] sm:$0xff] }
  0x2b   :  { %592 = vmatpush3.msk.msra.mxu1 %vm84_vm1, %v78_v3  ;;  %595 = vmatprep.mubr.msk.f32.mxu1 %vm756_vm0, %v755_v0  ;;  %v252_v9 = vld [vmem:[%s979_s5 + $0x40] sm:$0xff]  ;;  %v246_v15 = vld [vmem:[%s979_s5 + $0x10] sm:$0xff]  ;;  %v245_v16 = vld [vmem:[%s979_s5 + $0x8] sm:$0xff] }
  0x2c   :  { %593 = vmatprep.subr.mxu1 %v755_v0  ;;  %600 = vmatprep.subr.mxu0 %v755_v0  ;;  %v248_v13 = vld [vmem:[%s979_s5 + $0x20] sm:$0xff]  ;;  %v349_v18 = vld [vmem:[#allocation2 + $0x58] sm:$0xff]  ;;  %v348_v19 = vld [vmem:[#allocation2 + $0x50] sm:$0xff] }
  0x2d   :  { %594 = vmatpush3.msra.mxu1 %v77_v5  ;;  %601 = vmatpush3.msra.mxu0 %v254_v7  ;;  %v244_v17 = vld [vmem:[%s979_s5] sm:$0xff]  ;;  %v347_v20 = vld [vmem:[#allocation2 + $0x48] sm:$0xff]  ;;  %v345_v22 = vld [vmem:[#allocation2 + $0x38] sm:$0xff] }
  0x2e   :  { %596 = vmatmul.mubr.msk.f32.vlgmr.msra.gmra.mxu1 %vm158_vm3, %v75_v6  ;;  %602 = vmatprep.subr.mxu0 %v755_v0  ;;  %v346_v21 = vld [vmem:[#allocation2 + $0x40] sm:$0xff]  ;;  %v344_v23 = vld [vmem:[#allocation2 + $0x30] sm:$0xff]  ;;  %v343_v24 = vld [vmem:[#allocation2 + $0x28] sm:$0xff] }
  0x2f   :  { %625 = vmatprep.subr.mxu1 %v755_v0  ;;  %603 = vmatpush3.msra.mxu0 %v253_v8  ;;  %v342_v25 = vld [vmem:[#allocation2 + $0x20] sm:$0xff]  ;;  %v341_v26 = vld [vmem:[#allocation2 + $0x18] sm:$0xff]  ;;  %v340_v35 = vld [vmem:[#allocation2 + $0x10] sm:$0xff] }
  0x30   :  { %649 = vmatprep.mubr.msk.f32.mxu1 %vm756_vm0, %v755_v0  ;;  %604 = vmatprep.subr.mxu0 %v755_v0  ;;  %v535_v30 = vld [vmem:[%s978_s4] ss:$0 sm:$0xff]  ;;  %v339_v36 = vld [vmem:[#allocation2 + $0x8] sm:$0xff]  ;;  %v442_v38 = vld [vmem:[%s983_s9 + $0x58] sm:$0xff] }
  0x31   :  { %605 = vmatpush3.msra.mxu0 %v252_v9  ;;  %626 = vmatpush3.msra.mxu1 %v349_v18  ;;  %v338_v37 = vld [vmem:[#allocation2] sm:$0xff]  ;;  %v441_v39 = vld [vmem:[%s983_s9 + $0x50] sm:$0xff]  ;;  %v440_v40 = vld [vmem:[%s983_s9 + $0x48] sm:$0xff] }
  0x32   :  { %606 = vmatprep.subr.mxu0 %v755_v0  ;;  %627 = vmatprep.subr.mxu1 %v755_v0  ;;  %v439_v41 = vld [vmem:[%s983_s9 + $0x40] sm:$0xff]  ;;  %v438_v42 = vld [vmem:[%s983_s9 + $0x38] sm:$0xff]  ;;  %v437_v43 = vld [vmem:[%s983_s9 + $0x30] sm:$0xff] }
  0x33   :  { %607 = vmatpush3.msra.mxu0 %v251_v10  ;;  %628 = vmatpush3.msra.mxu1 %v348_v19  ;;  %v436_v44 = vld [vmem:[%s983_s9 + $0x28] sm:$0xff]  ;;  %v435_v45 = vld [vmem:[%s983_s9 + $0x20] sm:$0xff]  ;;  %v434_v46 = vld [vmem:[%s983_s9 + $0x18] sm:$0xff] }
  0x34   :  { %608 = vmatprep.subr.mxu0 %v755_v0  ;;  %629 = vmatprep.subr.mxu1 %v755_v0  ;;  %v536_v47 = vld [vmem:[%s980_s6] ss:$0 sm:$0xff]  ;;  %v433_v52 = vld [vmem:[%s983_s9 + $0x10] sm:$0xff]  ;;  %v432_v53 = vld [vmem:[%s983_s9 + $0x8] sm:$0xff] }
  0x35   :  { %609 = vmatpush3.msra.mxu0 %v250_v11  ;;  %630 = vmatpush3.msra.mxu1 %v347_v20  ;;  %v431_v54 = vld [vmem:[%s983_s9] sm:$0xff] }
  0x36   :  { %610 = vmatprep.subr.mxu0 %v755_v0  ;;  %631 = vmatprep.subr.mxu1 %v755_v0  ;;  %v538_v55 = vld [vmem:[#allocation4] ss:$0 sm:$0xff]  ;;  %v540_v60 = vld [vmem:[#allocation6] ss:$0 sm:$0xff] }
  0x37   :  { %611 = vmatpush3.msra.mxu0 %v249_v12  ;;  %632 = vmatpush3.msra.mxu1 %v346_v21 }
  0x38   :  { %612 = vmatprep.subr.mxu0 %v755_v0  ;;  %633 = vmatprep.subr.mxu1 %v755_v0 }
  0x39   :  { %613 = vmatpush3.msra.mxu0 %v248_v13  ;;  %634 = vmatpush3.msra.mxu1 %v345_v22 }
  0x3a   :  { %614 = vmatprep.subr.mxu0 %v755_v0  ;;  %635 = vmatprep.subr.mxu1 %v755_v0 }
  0x3b   :  { %615 = vmatpush3.msra.mxu0 %v247_v14  ;;  %636 = vmatpush3.msra.mxu1 %v344_v23 }
  0x3c   :  { %616 = vmatprep.subr.mxu0 %v755_v0  ;;  %637 = vmatprep.subr.mxu1 %v755_v0 }
  0x3d   :  { %617 = vmatpush3.msra.mxu0 %v246_v15  ;;  %638 = vmatpush3.msra.mxu1 %v343_v24 }
  0x3e   :  { %618 = vmatprep.subr.mxu0 %v755_v0  ;;  %639 = vmatprep.subr.mxu1 %v755_v0 }
  0x3f   :  { %619 = vmatpush3.msra.mxu0 %v245_v16  ;;  %640 = vmatpush3.msra.mxu1 %v342_v25 }
  0x40   :  { %620 = vmatprep.subr.mxu0 %v755_v0  ;;  %641 = vmatprep.subr.mxu1 %v755_v0 }
  0x41   :  { %621 = vmatpush3.msra.mxu0 %v244_v17  ;;  %642 = vmatpush3.msra.mxu1 %v341_v26 }
  0x42   :  { %652 = vmatprep.subr.mxu0 %v755_v0  ;;  %643 = vmatprep.subr.mxu1 %v755_v0 }
  0x43   :  { %644 = vmatpush3.msra.mxu1 %v340_v35 }
  0x44   :  { %645 = vmatprep.subr.mxu1 %v755_v0 }
  0x45   :  { %646 = vmatpush3.msra.mxu1 %v339_v36 }
  0x46   :  { %647 = vmatprep.subr.mxu1 %v755_v0 }
  0x47   :  { %648 = vmatpush3.msra.mxu1 %v338_v37 }
  0xea   :  { %v154_v27 = vpop.f32.mrf.mxu1 }
  0xec   :  { %v590_v28 = vpop.f32.mrf.mxu1 }
  0xee   :  { %v231_v29 = vpop.f32.mrf.mxu1 }
  0xef   :  { %v232_v31 = vadd.f32 %v231_v29, %v154_v27 }
  0xf0   :  { %v597_v32 = vpop.f32.mrf.mxu1 }
  0xf1   :  { %v242_v33 = vadd.f32 %v535_v30, %v232_v31 }
  0xf3   :  { %v243_v34 = vmax.f32 %v242_v33, 0.0 }
  0xf5   :  { %623 = vmatmul.mubr.msk.f32.vlgmr.msra.gmra.mxu0 %vm263_vm4, %v243_v34 }
  0xf6   :  { %676 = vmatprep.mubr.msk.f32.mxu0 %vm756_vm0, %v755_v0  ;;  %653 = vmatpush3.msra.mxu0 %v442_v38 }
  0xf7   :  { %654 = vmatprep.subr.mxu0 %v755_v0 }
  0xf8   :  { %655 = vmatpush3.msra.mxu0 %v441_v39 }
  0xf9   :  { %656 = vmatprep.subr.mxu0 %v755_v0 }
  0xfa   :  { %657 = vmatpush3.msra.mxu0 %v440_v40 }
  0xfb   :  { %658 = vmatprep.subr.mxu0 %v755_v0 }
  0xfc   :  { %659 = vmatpush3.msra.mxu0 %v439_v41 }
  0xfd   :  { %660 = vmatprep.subr.mxu0 %v755_v0 }
  0xfe   :  { %661 = vmatpush3.msra.mxu0 %v438_v42 }
  0xff   :  { %662 = vmatprep.subr.mxu0 %v755_v0 }
 0x100   :  { %663 = vmatpush3.msra.mxu0 %v437_v43 }
 0x101   :  { %664 = vmatprep.subr.mxu0 %v755_v0 }
 0x102   :  { %665 = vmatpush3.msra.mxu0 %v436_v44 }
 0x103   :  { %666 = vmatprep.subr.mxu0 %v755_v0 }
 0x104   :  { %667 = vmatpush3.msra.mxu0 %v435_v45 }
 0x105   :  { %668 = vmatprep.subr.mxu0 %v755_v0 }
 0x106   :  { %669 = vmatpush3.msra.mxu0 %v434_v46 }
 0x107   :  { %670 = vmatprep.subr.mxu0 %v755_v0 }
 0x108   :  { %671 = vmatpush3.msra.mxu0 %v433_v52 }
 0x109   :  { %672 = vmatprep.subr.mxu0 %v755_v0 }
 0x10a   :  { %673 = vmatpush3.msra.mxu0 %v432_v53 }
 0x10b   :  { %674 = vmatprep.subr.mxu0 %v755_v0 }
 0x10c   :  { %675 = vmatpush3.msra.mxu0 %v431_v54 }
 0x1b5   :  { %v333_v48 = vpop.f32.mrf.mxu0 }
 0x1b6   :  { %v334_v49 = vadd.f32 %v536_v47, %v333_v48 }
 0x1b7   :  { %v624_v50 = vpop.f32.mrf.mxu0 }
 0x1b8   :  { %v337_v51 = vmax.f32 %v334_v49, 0.0 }
 0x1ba   :  { %650 = vmatmul.mubr.msk.f32.vlgmr.msra.gmra.mxu1 %vm263_vm4, %v337_v51 }
 0x27a   :  { %v426_v56 = vpop.f32.mrf.mxu1 }
 0x27b   :  { %v427_v57 = vadd.f32 %v538_v55, %v426_v56 }
 0x27c   :  { %v651_v58 = vpop.f32.mrf.mxu1 }
 0x27d   :  { %v430_v59 = vmax.f32 %v427_v57, 0.0 }
 0x27f   :  { %677 = vmatmul.mubr.msk.f32.vlgmr.msra.gmra.mxu0 %vm263_vm4, %v430_v59 }
 0x33f   :  { %v519_v61 = vpop.f32.mrf.mxu0 }
 0x340   :  { %v520_v62 = vadd.f32 %v540_v60, %v519_v61 }
 0x341   :  { %v678_v63 = vpop.f32.mrf.mxu0 }
 0x342   :  { %524 = vst.msk [vmem:[%s985_s11] sm:$0xff] %vm523_vm5, %v520_v62 }
 0x343   :  { %529 = vsyncpa [#allocation3], 1 }
 0x344   :  { %530 = vsyncpa [#allocation5], 1 }

</bundles_post_ra>
